<compile_context>
chip_gen: v6e
topology: v6e:2x2x1
jax: 0.10.0
libtpu: 0.0.40
codegen_flags: <defaults>
</compile_context>

<pallas_src>
import jax
import jax.numpy as jnp
from jax.experimental import pallas as pl
from jax.experimental.pallas import tpu as pltpu


def _round_up(x, m):
    return ((x + m - 1) // m) * m


def _choose_row_tile(m):
    # Big tiles amortize the ~0.35us per-step grid overhead and fill the MXU, but
    # each v7x TensorCore needs >=2 grid steps to double-buffer x against compute.
    if m >= 4096:
        return 512          # >=8 steps total -> >=4 per v7x core
    if m >= 1024:
        return 256          # 256-wide LHS rows fill the v6e/v7x MXU; >=4 steps
    if m >= 256:
        return 128          # full v5e 128x128 pass; keeps v7x cores pipelined
    return m                # tiny problem: one full-extent block (always legal)


def _patch_embed_kernel(x_ref, w_ref, b_ref, o_ref):
    # x_ref: (tm, K)  compute_dtype patch rows
    # w_ref: (K, tn)  compute_dtype flattened conv weight (grid-resident)
    # b_ref: (1, tn)  f32 bias (grid-resident)
    # o_ref: (tm, tn) out_dtype
    acc = jnp.dot(x_ref[...], w_ref[...], preferred_element_type=jnp.float32)
    o_ref[...] = (acc + b_ref[...]).astype(o_ref.dtype)


def vision_embedding(image, weight, bias, patch_size, *,
                     compute_dtype=jnp.bfloat16, out_dtype=None):
    """image: (B, 3, H, W) NCHW; weight: (dim, 3, P, P); bias: (dim,).

    Returns (B, Np, dim), Np = (H//P)*(W//P); equals conv(x).flatten(2).transpose(1, 2).
    The GEMM runs in `compute_dtype` (bf16 default; pass jnp.float32 for f32-exact
    embeddings). The output dtype defaults to `compute_dtype` (the activation dtype),
    NOT image.dtype, so integer pixel inputs never truncate the embeddings.
    """
    if out_dtype is None:
        out_dtype = compute_dtype

    B, C, H, W = image.shape
    D = weight.shape[0]
    P = patch_size
    Hp, Wp = H // P, W // P
    Np = Hp * Wp
    K = C * P * P
    M = B * Np

    # --- patch extraction (plain JAX; one HBM pass, already in compute dtype) ----
    # Column order (c, ph, pw) matches how the Conv2d weight (D, C, P, P) flattens.
    # TODO(synk): fuse this rearrange into the kernel (grid over (B, Hp) with an
    # NCHW image BlockSpec + in-VMEM reshuffle) to drop this HBM pass entirely.
    x = image.astype(compute_dtype).reshape(B, C, Hp, P, Wp, P)
    x = jnp.transpose(x, (0, 2, 4, 1, 3, 5)).reshape(M, K)          # (M, K), K unpadded
    w2d = weight.reshape(D, K).T.astype(compute_dtype)              # (K, D)

    # --- lane-align only the output dim (unmasked vst is the big store lever) ----
    LANE = 128
    Dp = _round_up(D, LANE)
    b2d = bias.astype(jnp.float32).reshape(1, D)
    if Dp != D:
        w2d = jnp.pad(w2d, ((0, 0), (0, Dp - D)))
        b2d = jnp.pad(b2d, ((0, 0), (0, Dp - D)))

    tm = _choose_row_tile(M)
    ni = pl.cdiv(M, tm)                 # partial last tile is masked by Pallas
    # Split the embedding dim only when the resident weight would strain v7x VMEM.
    tn = 1024 if (Dp >= 2048 and Dp % 1024 == 0) else Dp
    nj = Dp // tn

    # Weight/bias never change across the grid when nj == 1: single-buffer them to
    # save VMEM; fall back to default double-buffering when they actually stream.
    resident_mode = pl.Buffered(1) if nj == 1 else pl.Buffered(2)

    cost = pl.CostEstimate(
        flops=2 * M * K * Dp,
        transcendentals=0,
        bytes_accessed=(M * K + K * Dp) * jnp.dtype(compute_dtype).itemsize
        + M * Dp * jnp.dtype(out_dtype).itemsize
        + Dp * 4,
    )

    out = pl.pallas_call(
        _patch_embed_kernel,
        out_shape=jax.ShapeDtypeStruct((M, Dp), out_dtype),
        grid_spec=pltpu.PrefetchScalarGridSpec(
            num_scalar_prefetch=0,
            grid=(ni, nj),
            in_specs=[
                pl.BlockSpec((tm, K), lambda i, j: (i, 0)),           # patch rows stream
                pl.BlockSpec((K, tn), lambda i, j: (0, j),            # weight, resident
                             pipeline_mode=resident_mode),
                pl.BlockSpec((1, tn), lambda i, j: (0, j),            # bias, resident
                             pipeline_mode=resident_mode),
            ],
            out_specs=pl.BlockSpec((tm, tn), lambda i, j: (i, j)),
        ),
        compiler_params=pltpu.CompilerParams(
            dimension_semantics=("parallel", "parallel"),
            vmem_limit_bytes=32 * 1024 * 1024,   # v5e default scoped limit is 16 MiB
        ),
        cost_estimate=cost,
    )(x, w2d, b2d)

    if Dp != D:
        out = out[:, :D]                # only for non-lane-multiple dims (small models)
    return out.reshape(B, Np, D)


def _reference(image, weight, bias, patch_size):
    # Plain-JAX reference: Conv2d(stride=kernel=P) then flatten(2).transpose(1, 2).
    out = jax.lax.conv_general_dilated(
        image, weight,
        window_strides=(patch_size, patch_size),
        padding="VALID",
        dimension_numbers=("NCHW", "OIHW", "NCHW"),
        precision=jax.lax.Precision.HIGHEST,
    ) + bias[None, :, None, None]
    B, D, Hp, Wp = out.shape
    return jnp.transpose(out.reshape(B, D, Hp * Wp), (0, 2, 1))


if __name__ == "__main__":
    # Small shapes: batch=2, in_channels=3 (fixed by the module), H=W=16, patch=4, dim=32.
    B, C, H, W = 2, 3, 16, 16
    patch_size = 4
    dim = 32

    key = jax.random.PRNGKey(0)
    k_img, k_w, k_b = jax.random.split(key, 3)

    image = jax.random.normal(k_img, (B, C, H, W), dtype=jnp.float32)
    # Deterministic synthetic parameters (shapes from nn.Conv2d(3, dim, P, stride=P)).
    fan_in = C * patch_size * patch_size
    bound = 1.0 / (fan_in ** 0.5)
    weight = jax.random.uniform(k_w, (dim, C, patch_size, patch_size),
                                minval=-bound, maxval=bound, dtype=jnp.float32)
    bias = jax.random.uniform(k_b, (dim,), minval=-bound, maxval=bound,
                              dtype=jnp.float32)

    out = vision_embedding(image, weight, bias, patch_size)
    out = jax.block_until_ready(out)

    # Reference on bf16-rounded operands (kernel GEMM runs in bf16 with f32
    # accumulation; kernel output is bf16 -> compare in f32 with bf16 tolerance).
    img_r = image.astype(jnp.bfloat16).astype(jnp.float32)
    w_r = weight.astype(jnp.bfloat16).astype(jnp.float32)
    ref = _reference(img_r, w_r, bias, patch_size)

    assert out.shape == (B, (H // patch_size) * (W // patch_size), dim)
    assert jnp.allclose(out.astype(jnp.float32), ref, atol=2e-2, rtol=2e-2), \
        "mismatch vs reference"

    print("KERNEL_OK")
</pallas_src>

<mosaic_0001>
module attributes {stable_mosaic.version = 11 : i64} {
  func.func @_patch_embed_kernel(%arg0: i32, %arg1: i32, %arg2: memref<32x48xbf16, #tpu.memory_space<vmem>>, %arg3: memref<48x128xbf16, #tpu.memory_space<vmem>>, %arg4: memref<1x128xf32, #tpu.memory_space<vmem>>, %arg5: memref<32x128xbf16, #tpu.memory_space<vmem>>) attributes {dimension_semantics = [#tpu.dimension_semantics<parallel>, #tpu.dimension_semantics<parallel>], iteration_bounds = array<i64: 1, 1>, scalar_prefetch = 0 : i64, scratch_operands = 0 : i64, tpu.core_type = #tpu.core_type<tc>, window_params = [{transform_indices = @transform_0, window_bounds = array<i64: 32, 48>}, {pipeline_mode = #tpu.pipeline_mode<synchronous>, transform_indices = @transform_1, window_bounds = array<i64: 48, 128>}, {pipeline_mode = #tpu.pipeline_mode<synchronous>, transform_indices = @transform_2, window_bounds = array<i64: 1, 128>}, {transform_indices = @transform_3, window_bounds = array<i64: 32, 128>}]} {
    %c0 = arith.constant 0 : index
    %c0_0 = arith.constant 0 : index
    %0 = vector.load %arg2[%c0, %c0_0] : memref<32x48xbf16, #tpu.memory_space<vmem>>, vector<32x48xbf16>
    %c0_1 = arith.constant 0 : index
    %c0_2 = arith.constant 0 : index
    %1 = vector.load %arg3[%c0_1, %c0_2] : memref<48x128xbf16, #tpu.memory_space<vmem>>, vector<48x128xbf16>
    %cst = arith.constant dense<0.000000e+00> : vector<32x128xf32>
    %2 = tpu.matmul %0, %1, %cst {dimension_numbers = #tpu.dot_dimension_numbers<[1], [0], [0], [1], [0, 0, 1, 1], [], []>} : vector<32x48xbf16>, vector<48x128xbf16>, vector<32x128xf32> -> vector<32x128xf32>
    %c0_3 = arith.constant 0 : index
    %c0_4 = arith.constant 0 : index
    %3 = vector.load %arg4[%c0_3, %c0_4] : memref<1x128xf32, #tpu.memory_space<vmem>>, vector<1x128xf32>
    %4 = vector.broadcast %3 : vector<1x128xf32> to vector<32x128xf32>
    %5 = arith.addf %2, %4 : vector<32x128xf32>
    %6 = arith.truncf %5 : vector<32x128xf32> to vector<32x128xbf16>
    %c0_5 = arith.constant 0 : index
    %c0_6 = arith.constant 0 : index
    %7 = vector.load %arg5[%c0_5, %c0_6] : memref<32x128xbf16, #tpu.memory_space<vmem>>, vector<32x128xbf16>
    tpu.vector_store %arg5[%c0_5, %c0_6], %6 {strides = array<i32>} : memref<32x128xbf16, #tpu.memory_space<vmem>>, vector<32x128xbf16>,
    return
  }
  func.func @transform_0(%arg0: i32, %arg1: i32) -> (i32, i32) {
    %c0_i32 = arith.constant 0 : i32
    %c0_i32_0 = arith.constant 0 : i32
    return %arg0, %c0_i32 : i32, i32
  }
  func.func @transform_1(%arg0: i32, %arg1: i32) -> (i32, i32) {
    %c0_i32 = arith.constant 0 : i32
    %c0_i32_0 = arith.constant 0 : i32
    return %c0_i32, %arg1 : i32, i32
  }
  func.func @transform_2(%arg0: i32, %arg1: i32) -> (i32, i32) {
    %c0_i32 = arith.constant 0 : i32
    %c0_i32_0 = arith.constant 0 : i32
    return %c0_i32, %arg1 : i32, i32
  }
  func.func @transform_3(%arg0: i32, %arg1: i32) -> (i32, i32) {
    %c0_i32 = arith.constant 0 : i32
    return %arg0, %arg1 : i32, i32
  }
}

</mosaic_0001>

<bundles_post_ra>
// kernel: tpu_custom_call.1
= control target key start
LH: loop header
LB: loop body
LE: loop exit
PB: predicated region body
PF: predicated region fallthrough
CT: control target
= control target key end

     0   :  { %8 = vsyncpa [#allocation3], 0  ;;  %s347_s0 = inlined_call_operand.hbm [shape: bf16[32,48], index: 0, kind: input, shape index: {}]   ;;  %s348_s1 = inlined_call_operand.hbm [shape: bf16[48,128], index: 1, kind: input, shape index: {}]   ;;  %s349_s2 = inlined_call_operand.vmem [shape: f32[1,128], index: 2, kind: input, shape index: {}]   ;;  %s350_s3 = inlined_call_operand.hbm [shape: bf16[32,128], index: 3, kind: output, shape index: {}]  }
   0x1   :  { %9 = vsyncpa [#allocation6], 0 }
   0x2   :  { %10 = vsyncpa [#allocation4], 0  ;;  %s301_s12 = smov [#allocation2]  }
   0x3   :  { %s16_s13 = sshll.u32 %s301_s12, 4  ;;  %s17_s13 = int_to_ptr.vmem [resolvable:$true] %s16_s13 }
   0x4   :  { %s243_s14 = scalar_lea.vmem %s17_s13, 256  ;;  %p248_p1 = scmp.lt.s32.totalorder %s17_s13, %s17_s13 }
   0x5   :  { %p244_p0 = scmp.ne.s32.totalorder %s17_s13, %s243_s14  ;;  %p249_p2 = scmp.lt.s32.totalorder %s243_s14, %s243_s14 }
   0x7   :  { %p250_p3 = por %p249_p2, %p248_p1 }
   0x9   :  { %p251_p4 = pnand %p250_p3, %p244_p0 }
   0xb   :  { %254 = shalt.err (!%p251_p4)
}
   0xc   :  { %s302_s15 = smov 64   ;;  %s303_s16 = smov 4  }
   0xd   :  { %22 = dma.hbm_to_vmem [thread:$0]  %s347_s0, 256, %s17_s13, [#allocation3], %s302_s15, %s302_s15, %s303_s16  }
   0xe   :  { %s304_s19 = smov [#allocation5]  }
   0xf   :  { %s28_s20 = sshll.u32 %s304_s19, 4  ;;  %s29_s20 = int_to_ptr.vmem [resolvable:$true] %s28_s20 }
  0x10   :  { %s263_s21 = scalar_lea.vmem %s29_s20, 384  ;;  %p268_p6 = scmp.lt.s32.totalorder %s29_s20, %s29_s20 }
  0x11   :  { %p264_p5 = scmp.ne.s32.totalorder %s29_s20, %s263_s21  ;;  %p269_p7 = scmp.lt.s32.totalorder %s263_s21, %s263_s21 }
  0x13   :  { %p270_p8 = por %p269_p7, %p268_p6 }
  0x15   :  { %p271_p9 = pnand %p270_p8, %p264_p5 }
  0x17   :  { %274 = shalt.err (!%p271_p9)
}
  0x18   :  { %34 = dma.hbm_to_vmem [thread:$0]  %s348_s1, 384, %s29_s20, [#allocation6], %s302_s15, %s302_s15, %s303_s16  }
  0x19   :  { %295 = dma.done.wait [#allocation3], 256  }
  0x1a   :  { %296 = vsyncadd [#allocation3], 4294967040 }
  0x1b   :  { %297 = dma.done.wait [#allocation6], 384  }
  0x1c   :  { %298 = vsyncadd [#allocation6], 4294966912  ;;  %v230_v0 = vld [vmem:[#allocation5 + $0x10] sm:$0xff]   ;;  %v231_v1 = vld [vmem:[#allocation5 + $0x8] sm:$0xff]   ;;  %vm89_vm0 = vcmask 392192   ;;  %s305_s24 = smov [#allocation7]  }
  0x1d   :  { %215 = vmatprep.subr.bf16.mxu0 %v230_v0  ;;  %v233_v2 = vld [vmem:[#allocation2] sm:$0xff]   ;;  %v232_v3 = vld [vmem:[#allocation5] sm:$0xff]   ;;  %v234_v4 = vld [vmem:[#allocation2 + $0x8] sm:$0xff]   ;;  %s170_s25 = sshll.u32 %s305_s24, 4  ;;  %s171_s25 = int_to_ptr.vmem [resolvable:$true] %s170_s25 }
  0x1e   :  { %216 = vmatpush3.bf16.msra.mxu0 %v230_v0  ;;  %221 = vmatprep.mubr.msk.bf16.mxu0 %vm89_vm0, %v233_v2  ;;  %v183_v6 = vld [vmem:[%s349_s2] ss:$0 sm:$0xff]  ;;  %s275_s26 = scalar_lea.vmem %s171_s25, 256  ;;  %p280_p11 = scmp.lt.s32.totalorder %s171_s25, %s171_s25 }
  0x1f   :  { %217 = vmatprep.subr.bf16.mxu0 %v231_v1  ;;  %p276_p10 = scmp.ne.s32.totalorder %s171_s25, %s275_s26  ;;  %p281_p12 = scmp.lt.s32.totalorder %s275_s26, %s275_s26 }
  0x21   :  { %p282_p13 = por %p281_p12, %p280_p11 }
  0x22   :  { %218 = vmatpush3.bf16.msra.mxu0 %v231_v1 }
  0x23   :  { %219 = vmatprep.subr.bf16.mxu0 %v232_v3  ;;  %p283_p0 = pnand %p282_p13, %p276_p10 }
  0x26   :  { %220 = vmatpush3.bf16.msra.mxu0 %v232_v3 }
  0x29   :  { %222 = vmatmul.mubr.msk.bf16.vlgmr.msra.gmra.mxu0 %vm89_vm0, %v234_v4 }
  0xe9   :  { %v223_v5 = vpop.f32.mrf.mxu0 }
  0xea   :  { %v139_v9 = vadd.f32 %v223_v5, %v183_v6 }
  0xeb   :  { %v130_v7 = vpop.f32.mrf.mxu0 }
  0xec   :  { %v131_v12 = vadd.f32 %v183_v6, %v130_v7 }
  0xed   :  { %v224_v8 = vpop.f32.mrf.mxu0 }
  0xee   :  { %v142_v10 = vadd.f32 %v224_v8, %v183_v6 }
  0xef   :  { %v133_v11 = vpop.f32.mrf.mxu0 }
  0xf0   :  { %v207_v13 = vpack.c.bf16 %v142_v10, %v139_v9  ;;  %v134_v14 = vadd.f32 %v183_v6, %v133_v11 }
  0xf2   :  { %209 = vst [vmem:[#allocation7 + $0x8] sm:$0xff] %v207_v13   ;;  %v202_v15 = vpack.c.bf16 %v134_v14, %v131_v12 }
  0xf4   :  { %203 = vst [vmem:[#allocation7] sm:$0xff] %v202_v15  }
  0xf5   :  { %286 = shalt.err (!%p283_p0)
}
  0xf6   :  { %176 = dma.vmem_to_hbm [thread:$0]  %s171_s25, 256, %s350_s3, [#allocation4], %s302_s15, %s302_s15, %s303_s16  }
  0xf7   :  { %299 = dma.done.wait [#allocation4], 256  }
  0xf8   :  { %300 = vsyncadd [#allocation4], 4294967040 }
  0xf9   :  { %180 = vsyncpa [#allocation3], 1 }
  0xfa   :  { %181 = vsyncpa [#allocation6], 1 }
  0xfb   :  { %182 = vsyncpa [#allocation4], 1 }

</bundles_post_ra>
